<compile_context>
chip_gen: v5e
topology: v5e:2x2
jax: 0.10.0
libtpu: 0.0.40
codegen_flags: <defaults>
</compile_context>

<pallas_src>
import jax
import jax.numpy as jnp
from jax.experimental import pallas as pl
from jax.experimental.pallas import tpu as pltpu


def _round_up(x, m):
    return ((x + m - 1) // m) * m


# Fixed per-grid-step overhead (~0.35 us) expressed as equivalent rows of matmul
# work for this small network; used to trade dead padded rows vs. step count.
_STEP_OVERHEAD_ROWS = 384


def _choose_batch_tile(B, max_tile):
    """Pick the batch tile (rows per grid step).

    * B <= 256       : one full-extent block (nothing to amortize).
    * mid batches    : two tiles so ("parallel",) grid sharding keeps both v7x
                       TensorCores busy.
    * large batches  : tile from {256..max_tile}; score = dead rows in the
                       partial last block + per-step fixed overhead; prefer >=2
                       grid steps and larger tiles on ties.
    Partial last blocks are handled by Pallas (clamped reads, dropped OOB
    writes), so the wrapper never pads or copies x.
    """
    if B <= 256:
        return max(B, 1)
    b8 = _round_up(B, 8)
    if b8 <= 2 * max_tile:
        return min(max_tile, _round_up((b8 + 1) // 2, 8))
    best = None
    for t in (256, 512, 1024, 2048, 4096, 8192):
        if t > max_tile:
            break
        steps = pl.cdiv(B, t)
        cost = (steps * t - B) + steps * _STEP_OVERHEAD_ROWS
        key = (cost, steps < 2, -t)
        if best is None or key < best[0]:
            best = (key, t)
    return best[1]


# ----------------------------------------------------------------------------
# Kernel: one batch tile per grid step, weights resident (constant index_maps).
# ----------------------------------------------------------------------------
def mlp_kernel(x_ref, w1_ref, b1_ref, w2_ref, b2_ref, w3_ref, b3_ref, out_ref):
    # fc1 + folded BatchNorm1d(512) + ReLU.  x arrives fp32; the bf16 cast is
    # done in-kernel on the tile (VPU has slack) instead of a separate XLA pass.
    x = x_ref[...].astype(jnp.bfloat16)
    h1 = jnp.dot(x, w1_ref[...], preferred_element_type=jnp.float32)
    h1 = jnp.maximum(h1 + b1_ref[...], 0.0)

    # Dropout(0.3) is identity in eval mode.
    # TODO(synk): training-mode dropout (pltpu.prng_seed + prng_random_bits)
    # is not implemented; this kernel is eval-only.

    # fc2 + folded BatchNorm1d(256) + ReLU
    h2 = jnp.dot(h1.astype(jnp.bfloat16), w2_ref[...],
                 preferred_element_type=jnp.float32)
    h2 = jnp.maximum(h2 + b2_ref[...], 0.0)

    # fc3 logits (output columns padded to a lane-dense 128 slab)
    out = jnp.dot(h2.astype(jnp.bfloat16), w3_ref[...],
                  preferred_element_type=jnp.float32)
    out_ref[...] = (out + b3_ref[...]).astype(out_ref.dtype)


# ----------------------------------------------------------------------------
# Parameter construction (synthetic, matches the PyTorch module's shapes).
# ----------------------------------------------------------------------------
def make_raw_params(input_dim, num_classes, key):
    ks = jax.random.split(key, 16)

    def linear(kw, kb, fan_in, fan_out):
        bound = 1.0 / jnp.sqrt(fan_in)
        w = jax.random.uniform(kw, (fan_in, fan_out), jnp.float32, -bound, bound)
        b = jax.random.uniform(kb, (fan_out,), jnp.float32, -bound, bound)
        return w, b

    w1, b1 = linear(ks[0], ks[1], input_dim, 512)
    w2, b2 = linear(ks[2], ks[3], 512, 256)
    w3, b3 = linear(ks[4], ks[5], 256, num_classes)

    def bn(kg, kb, km, kv, n):
        gamma = 1.0 + 0.1 * jax.random.normal(kg, (n,), jnp.float32)
        beta = 0.1 * jax.random.normal(kb, (n,), jnp.float32)
        mean = 0.1 * jax.random.normal(km, (n,), jnp.float32)
        var = jnp.abs(jax.random.normal(kv, (n,), jnp.float32)) + 0.5
        return gamma, beta, mean, var

    g1, be1, m1, v1 = bn(ks[6], ks[7], ks[8], ks[9], 512)
    g2, be2, m2, v2 = bn(ks[10], ks[11], ks[12], ks[13], 256)

    return dict(w1=w1, b1=b1, w2=w2, b2=b2, w3=w3, b3=b3,
                g1=g1, be1=be1, m1=m1, v1=v1,
                g2=g2, be2=be2, m2=m2, v2=v2)


def prepare_params(raw, num_classes, eps=1e-5):
    """Fold eval-mode BatchNorm + bias into weights/one bias, pad fc3 columns
    to a 128-lane slab, cast weights to bf16.  fc1's K dim is NOT padded."""
    n_pad = _round_up(max(num_classes, 1), 128)

    # y = (x@W + b - mean)/sqrt(var+eps)*gamma + beta  ==  x@(W*s) + (b*s + t)
    s1 = raw["g1"] / jnp.sqrt(raw["v1"] + eps)
    t1 = raw["be1"] - raw["m1"] * s1
    w1 = raw["w1"] * s1[None, :]
    b1 = raw["b1"] * s1 + t1

    s2 = raw["g2"] / jnp.sqrt(raw["v2"] + eps)
    t2 = raw["be2"] - raw["m2"] * s2
    w2 = raw["w2"] * s2[None, :]
    b2 = raw["b2"] * s2 + t2

    w3 = jnp.pad(raw["w3"], ((0, 0), (0, n_pad - num_classes)))
    b3 = jnp.pad(raw["b3"], (0, n_pad - num_classes))

    return dict(
        w1=w1.astype(jnp.bfloat16), b1=b1.reshape(1, -1).astype(jnp.float32),
        w2=w2.astype(jnp.bfloat16), b2=b2.reshape(1, -1).astype(jnp.float32),
        w3=w3.astype(jnp.bfloat16), b3=b3.reshape(1, -1).astype(jnp.float32),
    )


# ----------------------------------------------------------------------------
# Wrapper: batch-tiled pallas_call with resident weights.
# ----------------------------------------------------------------------------
def baseline_mlp_forward(x, params, num_classes, *, max_batch_tile=2048,
                         out_dtype=jnp.bfloat16, trim=True):
    B, D = x.shape
    assert D == params["w1"].shape[0], "input feature dim mismatch"
    h1_dim = params["w1"].shape[1]
    h2_dim = params["w2"].shape[1]
    n_pad = params["w3"].shape[1]
    out_isz = jnp.dtype(out_dtype).itemsize

    tb = _choose_batch_tile(B, max_batch_tile)

    def vmem_bytes(t):
        weights = 2 * 2 * (D * h1_dim + h1_dim * h2_dim + h2_dim * n_pad)   # bf16, 2 bufs
        io = 2 * t * D * 4 + 2 * t * n_pad * out_isz                        # x / out, 2 bufs
        temps = t * (h1_dim + h2_dim) * 4 + t * (h1_dim + h2_dim) * 2       # fp32 h + bf16 copies
        return weights + io + temps

    # Keep well under v7x's 64 MiB physical VMEM (v5e/v6e have 128 MiB).
    while tb > 256 and vmem_bytes(tb) > (40 << 20):
        tb = _round_up(tb // 2, 8)
    grid = (pl.cdiv(B, tb),)

    rows = grid[0] * tb
    flops = 2 * rows * (D * h1_dim + h1_dim * h2_dim + h2_dim * n_pad)
    bytes_accessed = (
        B * D * 4                                                    # x (fp32, read once)
        + (D * h1_dim + h1_dim * h2_dim + h2_dim * n_pad) * 2        # bf16 weights
        + (h1_dim + h2_dim + n_pad) * 4                              # fp32 biases
        + B * n_pad * out_isz                                        # logits
    )

    out = pl.pallas_call(
        mlp_kernel,
        out_shape=jax.ShapeDtypeStruct((B, n_pad), out_dtype),
        grid=grid,
        in_specs=[
            pl.BlockSpec((tb, D), lambda i: (i, 0)),            # x tile (fp32, cast in-kernel)
            pl.BlockSpec((D, h1_dim), lambda i: (0, 0)),        # w1 (resident, no K pad)
            pl.BlockSpec((1, h1_dim), lambda i: (0, 0)),        # folded b1
            pl.BlockSpec((h1_dim, h2_dim), lambda i: (0, 0)),   # w2 (resident)
            pl.BlockSpec((1, h2_dim), lambda i: (0, 0)),        # folded b2
            pl.BlockSpec((h2_dim, n_pad), lambda i: (0, 0)),    # w3 (128-lane padded)
            pl.BlockSpec((1, n_pad), lambda i: (0, 0)),         # b3
        ],
        out_specs=pl.BlockSpec((tb, n_pad), lambda i: (i, 0)),
        compiler_params=pltpu.CompilerParams(
            dimension_semantics=("parallel",),
            vmem_limit_bytes=int(min(64 << 20, max(32 << 20, 2 * vmem_bytes(tb)))),
        ),
        cost_estimate=pl.CostEstimate(
            flops=flops, transcendentals=0, bytes_accessed=bytes_accessed),
    )(x, params["w1"], params["b1"], params["w2"], params["b2"],
      params["w3"], params["b3"])

    # Rows are already exact (out_shape has B rows; OOB rows of a partial last
    # block are dropped).  The lane slice below is a separate copy of the
    # output; perf-sensitive consumers should pass trim=False and slice/fuse
    # the class dimension downstream.
    if trim:
        out = out[:, :num_classes]
    return out


# ----------------------------------------------------------------------------
# Pure-JAX references.
# ----------------------------------------------------------------------------
def reference_forward(x, params, num_classes):
    """Same folded / padded / bf16 params as the kernel (tight tolerance)."""
    h1 = jnp.maximum(
        jnp.dot(x.astype(jnp.bfloat16), params["w1"],
                preferred_element_type=jnp.float32) + params["b1"], 0.0)
    h2 = jnp.maximum(
        jnp.dot(h1.astype(jnp.bfloat16), params["w2"],
                preferred_element_type=jnp.float32) + params["b2"], 0.0)
    out = jnp.dot(h2.astype(jnp.bfloat16), params["w3"],
                  preferred_element_type=jnp.float32) + params["b3"]
    return out[:, :num_classes]


def reference_forward_fp32(x, raw, eps=1e-5):
    """Unfused fp32 math (validates BN folding against the true model)."""
    h = x @ raw["w1"] + raw["b1"]
    h = (h - raw["m1"]) / jnp.sqrt(raw["v1"] + eps) * raw["g1"] + raw["be1"]
    h = jnp.maximum(h, 0.0)
    h = h @ raw["w2"] + raw["b2"]
    h = (h - raw["m2"]) / jnp.sqrt(raw["v2"] + eps) * raw["g2"] + raw["be2"]
    h = jnp.maximum(h, 0.0)
    return h @ raw["w3"] + raw["b3"]


if __name__ == "__main__":
    key = jax.random.PRNGKey(0)
    k_x, k_p = jax.random.split(key)

    B, input_dim, num_classes = 8, 64, 10
    x = jax.random.normal(k_x, (B, input_dim), jnp.float32)

    raw = make_raw_params(input_dim, num_classes, k_p)
    params = prepare_params(raw, num_classes)

    # Recommended usage: take the lane-padded logits and let the consumer
    # slice / fuse the class dimension.
    out_padded = jax.block_until_ready(
        baseline_mlp_forward(x, params, num_classes, trim=False))
    out = out_padded[:, :num_classes]          # consumer-side slice (test only)
    assert out.shape == (B, num_classes)

    # Tight check vs a pure-JAX forward built from the same folded bf16 params.
    ref = reference_forward(x, params, num_classes)
    err = float(jnp.max(jnp.abs(out.astype(jnp.float32) - ref)))
    assert err < 2e-2, f"mismatch vs folded reference (max abs err {err})"

    # Loose sanity check of the BN folding against unfused fp32 math.
    ref32 = reference_forward_fp32(x, raw)[:, :num_classes]
    err32 = float(jnp.max(jnp.abs(out.astype(jnp.float32) - ref32)))
    assert err32 < 1e-1, f"mismatch vs fp32 reference (max abs err {err32})"

    print("KERNEL_OK")
</pallas_src>

<mosaic_0001>
module attributes {stable_mosaic.version = 11 : i64} {
  func.func @mlp_kernel(%arg0: i32, %arg1: memref<8x64xf32, #tpu.memory_space<vmem>>, %arg2: memref<64x512xbf16, #tpu.memory_space<vmem>>, %arg3: memref<1x512xf32, #tpu.memory_space<vmem>>, %arg4: memref<512x256xbf16, #tpu.memory_space<vmem>>, %arg5: memref<1x256xf32, #tpu.memory_space<vmem>>, %arg6: memref<256x128xbf16, #tpu.memory_space<vmem>>, %arg7: memref<1x128xf32, #tpu.memory_space<vmem>>, %arg8: memref<8x128xbf16, #tpu.memory_space<vmem>>) attributes {dimension_semantics = [#tpu.dimension_semantics<parallel>], iteration_bounds = array<i64: 1>, scalar_prefetch = 0 : i64, scratch_operands = 0 : i64, tpu.core_type = #tpu.core_type<tc>, window_params = [{transform_indices = @transform_0, window_bounds = array<i64: 8, 64>}, {pipeline_mode = #tpu.pipeline_mode<synchronous>, transform_indices = @transform_1, window_bounds = array<i64: 64, 512>}, {pipeline_mode = #tpu.pipeline_mode<synchronous>, transform_indices = @transform_2, window_bounds = array<i64: 1, 512>}, {pipeline_mode = #tpu.pipeline_mode<synchronous>, transform_indices = @transform_3, window_bounds = array<i64: 512, 256>}, {pipeline_mode = #tpu.pipeline_mode<synchronous>, transform_indices = @transform_4, window_bounds = array<i64: 1, 256>}, {pipeline_mode = #tpu.pipeline_mode<synchronous>, transform_indices = @transform_5, window_bounds = array<i64: 256, 128>}, {pipeline_mode = #tpu.pipeline_mode<synchronous>, transform_indices = @transform_6, window_bounds = array<i64: 1, 128>}, {transform_indices = @transform_7, window_bounds = array<i64: 8, 128>}]} {
    %c0 = arith.constant 0 : index
    %c0_0 = arith.constant 0 : index
    %0 = vector.load %arg1[%c0, %c0_0] : memref<8x64xf32, #tpu.memory_space<vmem>>, vector<8x64xf32>
    %1 = arith.truncf %0 : vector<8x64xf32> to vector<8x64xbf16>
    %c0_1 = arith.constant 0 : index
    %c0_2 = arith.constant 0 : index
    %2 = vector.load %arg2[%c0_1, %c0_2] : memref<64x512xbf16, #tpu.memory_space<vmem>>, vector<64x512xbf16>
    %cst = arith.constant dense<0.000000e+00> : vector<8x512xf32>
    %3 = tpu.matmul %1, %2, %cst {dimension_numbers = #tpu.dot_dimension_numbers<[1], [0], [0], [1], [0, 0, 1, 1], [], []>} : vector<8x64xbf16>, vector<64x512xbf16>, vector<8x512xf32> -> vector<8x512xf32>
    %c0_3 = arith.constant 0 : index
    %c0_4 = arith.constant 0 : index
    %4 = vector.load %arg3[%c0_3, %c0_4] : memref<1x512xf32, #tpu.memory_space<vmem>>, vector<1x512xf32>
    %5 = vector.broadcast %4 : vector<1x512xf32> to vector<8x512xf32>
    %6 = arith.addf %3, %5 : vector<8x512xf32>
    %cst_5 = arith.constant 0.000000e+00 : f32
    %7 = vector.broadcast %cst_5 : f32 to vector<8x512xf32>
    %8 = arith.maximumf %6, %7 : vector<8x512xf32>
    %9 = arith.truncf %8 : vector<8x512xf32> to vector<8x512xbf16>
    %c0_6 = arith.constant 0 : index
    %c0_7 = arith.constant 0 : index
    %10 = vector.load %arg4[%c0_6, %c0_7] : memref<512x256xbf16, #tpu.memory_space<vmem>>, vector<512x256xbf16>
    %cst_8 = arith.constant dense<0.000000e+00> : vector<8x256xf32>
    %11 = tpu.matmul %9, %10, %cst_8 {dimension_numbers = #tpu.dot_dimension_numbers<[1], [0], [0], [1], [0, 0, 1, 1], [], []>} : vector<8x512xbf16>, vector<512x256xbf16>, vector<8x256xf32> -> vector<8x256xf32>
    %c0_9 = arith.constant 0 : index
    %c0_10 = arith.constant 0 : index
    %12 = vector.load %arg5[%c0_9, %c0_10] : memref<1x256xf32, #tpu.memory_space<vmem>>, vector<1x256xf32>
    %13 = vector.broadcast %12 : vector<1x256xf32> to vector<8x256xf32>
    %14 = arith.addf %11, %13 : vector<8x256xf32>
    %cst_11 = arith.constant 0.000000e+00 : f32
    %15 = vector.broadcast %cst_11 : f32 to vector<8x256xf32>
    %16 = arith.maximumf %14, %15 : vector<8x256xf32>
    %17 = arith.truncf %16 : vector<8x256xf32> to vector<8x256xbf16>
    %c0_12 = arith.constant 0 : index
    %c0_13 = arith.constant 0 : index
    %18 = vector.load %arg6[%c0_12, %c0_13] : memref<256x128xbf16, #tpu.memory_space<vmem>>, vector<256x128xbf16>
    %cst_14 = arith.constant dense<0.000000e+00> : vector<8x128xf32>
    %19 = tpu.matmul %17, %18, %cst_14 {dimension_numbers = #tpu.dot_dimension_numbers<[1], [0], [0], [1], [0, 0, 1, 1], [], []>} : vector<8x256xbf16>, vector<256x128xbf16>, vector<8x128xf32> -> vector<8x128xf32>
    %c0_15 = arith.constant 0 : index
    %c0_16 = arith.constant 0 : index
    %20 = vector.load %arg7[%c0_15, %c0_16] : memref<1x128xf32, #tpu.memory_space<vmem>>, vector<1x128xf32>
    %21 = vector.broadcast %20 : vector<1x128xf32> to vector<8x128xf32>
    %22 = arith.addf %19, %21 : vector<8x128xf32>
    %23 = arith.truncf %22 : vector<8x128xf32> to vector<8x128xbf16>
    %c0_17 = arith.constant 0 : index
    %c0_18 = arith.constant 0 : index
    %24 = vector.load %arg8[%c0_17, %c0_18] : memref<8x128xbf16, #tpu.memory_space<vmem>>, vector<8x128xbf16>
    tpu.vector_store %arg8[%c0_17, %c0_18], %23 {strides = array<i32>} : memref<8x128xbf16, #tpu.memory_space<vmem>>, vector<8x128xbf16>,
    return
  }
  func.func @transform_0(%arg0: i32) -> (i32, i32) {
    %c0_i32 = arith.constant 0 : i32
    %c0_i32_0 = arith.constant 0 : i32
    return %arg0, %c0_i32 : i32, i32
  }
  func.func @transform_1(%arg0: i32) -> (i32, i32) {
    %c0_i32 = arith.constant 0 : i32
    %c0_i32_0 = arith.constant 0 : i32
    %c0_i32_1 = arith.constant 0 : i32
    return %c0_i32, %c0_i32_0 : i32, i32
  }
  func.func @transform_2(%arg0: i32) -> (i32, i32) {
    %c0_i32 = arith.constant 0 : i32
    %c0_i32_0 = arith.constant 0 : i32
    %c0_i32_1 = arith.constant 0 : i32
    return %c0_i32, %c0_i32_0 : i32, i32
  }
  func.func @transform_3(%arg0: i32) -> (i32, i32) {
    %c0_i32 = arith.constant 0 : i32
    %c0_i32_0 = arith.constant 0 : i32
    %c0_i32_1 = arith.constant 0 : i32
    return %c0_i32, %c0_i32_0 : i32, i32
  }
  func.func @transform_4(%arg0: i32) -> (i32, i32) {
    %c0_i32 = arith.constant 0 : i32
    %c0_i32_0 = arith.constant 0 : i32
    %c0_i32_1 = arith.constant 0 : i32
    return %c0_i32, %c0_i32_0 : i32, i32
  }
  func.func @transform_5(%arg0: i32) -> (i32, i32) {
    %c0_i32 = arith.constant 0 : i32
    %c0_i32_0 = arith.constant 0 : i32
    %c0_i32_1 = arith.constant 0 : i32
    return %c0_i32, %c0_i32_0 : i32, i32
  }
  func.func @transform_6(%arg0: i32) -> (i32, i32) {
    %c0_i32 = arith.constant 0 : i32
    %c0_i32_0 = arith.constant 0 : i32
    %c0_i32_1 = arith.constant 0 : i32
    return %c0_i32, %c0_i32_0 : i32, i32
  }
  func.func @transform_7(%arg0: i32) -> (i32, i32) {
    %c0_i32 = arith.constant 0 : i32
    %c0_i32_0 = arith.constant 0 : i32
    return %arg0, %c0_i32 : i32, i32
  }
}

</mosaic_0001>

<bundles_post_ra>
// kernel: tpu_custom_call.1
= control target key start
LH: loop header
LB: loop body
LE: loop exit
PB: predicated region body
PF: predicated region fallthrough
CT: control target
= control target key end

     0   :  { %12 = vsyncpa [#allocation3], 0  ;;  %s1686_s0 = inlined_call_operand.hbm [shape: f32[8,64], index: 0, kind: input, shape index: {}]   ;;  %s1687_s1 = inlined_call_operand.hbm [shape: bf16[64,512], index: 1, kind: input, shape index: {}]   ;;  %s1688_s2 = inlined_call_operand.hbm [shape: f32[1,512], index: 2, kind: input, shape index: {}]   ;;  %s1689_s3 = inlined_call_operand.hbm [shape: bf16[512,256], index: 3, kind: input, shape index: {}]   ;;  %s1690_s4 = inlined_call_operand.vmem [shape: f32[1,256], index: 4, kind: input, shape index: {}]   ;;  %s1691_s5 = inlined_call_operand.hbm [shape: bf16[256,128], index: 5, kind: input, shape index: {}]   ;;  %s1692_s6 = inlined_call_operand.vmem [shape: f32[1,128], index: 6, kind: input, shape index: {}]   ;;  %s1693_s7 = inlined_call_operand.hbm [shape: bf16[8,128], index: 7, kind: output, shape index: {}]  }
   0x1   :  { %13 = vsyncpa [#allocation6], 0 }
   0x2   :  { %14 = vsyncpa [#allocation9], 0  ;;  %s31_s26 = sshll.u32 %s1687_s1, 4  ;;  %s32_s26 = int_to_ptr.hbm [resolvable:$true] %s31_s26 }
   0x3   :  { %15 = vsyncpa [#allocation4], 0  ;;  %s1600_s27 = smov [#allocation5]   ;;  %s55_s8 = sshll.u32 %s1689_s3, 4  ;;  %s56_s8 = int_to_ptr.hbm [resolvable:$true] %s55_s8 }
   0x4   :  { %s33_s28 = sshll.u32 %s1600_s27, 4  ;;  %s1601_s9 = smov 256   ;;  %s34_s28 = int_to_ptr.vmem [resolvable:$true] %s33_s28 }
   0x5   :  { %s1602_s10 = smov 16   ;;  %s1603_s11 = smov [#allocation8]  }
   0x6   :  { %39 = dma.hbm_to_vmem [thread:$0]  %s32_s26, 2048, %s34_s28, [#allocation6], %s1601_s9, %s1601_s9, %s1602_s10  }
   0x7   :  { %s57_s12 = sshll.u32 %s1603_s11, 4  ;;  %s1604_s13 = smov 128   ;;  %s58_s12 = int_to_ptr.vmem [resolvable:$true] %s57_s12 }
   0x8   :  { %s1605_s14 = smov 8   ;;  %s21_s16 = sshll.u32 %s1686_s0, 4  ;;  %s22_s16 = int_to_ptr.hbm [resolvable:$true] %s21_s16 }
   0x9   :  { %63 = dma.hbm_to_vmem [thread:$0]  %s56_s8, 8192, %s58_s12, [#allocation9], %s1604_s13, %s1604_s13, %s1605_s14  }
   0xa   :  { %s1606_s17 = smov [#allocation2]   ;;  %s45_s20 = sshll.u32 %s1688_s2, 4  ;;  %s46_s20 = int_to_ptr.hbm [resolvable:$true] %s45_s20 }
   0xb   :  { %s23_s18 = sshll.u32 %s1606_s17, 4  ;;  %s1607_s21 = smov [#allocation7]   ;;  %s24_s18 = int_to_ptr.vmem [resolvable:$true] %s23_s18 }
   0xc   :  { %26 = dma.hbm_to_vmem [thread:$0]  %s22_s16, 128, %s24_s18, [#allocation3]  }
   0xd   :  { %s47_s22 = sshll.u32 %s1607_s21, 4  ;;  %s70_s25 = sshll.u32 %s1691_s5, 4  ;;  %s48_s22 = int_to_ptr.vmem [resolvable:$true] %s47_s22  ;;  %s71_s25 = int_to_ptr.hbm [resolvable:$true] %s70_s25 }
   0xe   :  { %50 = dma.hbm_to_vmem [thread:$0]  %s46_s20, 64, %s48_s22, [#allocation6]  }
   0xf   :  { %s1608_s0 = smov [#allocation10]   ;;  %s1609_s27 = smov 64  }
  0x10   :  { %s72_s26 = sshll.u32 %s1608_s0, 4  ;;  %s1610_s28 = smov 4   ;;  %s73_s26 = int_to_ptr.vmem [resolvable:$true] %s72_s26 }
  0x11   :  { %78 = dma.hbm_to_vmem [thread:$0]  %s71_s25, 2048, %s73_s26, [#allocation9], %s1609_s27, %s1609_s27, %s1610_s28  }
  0x12   :  { %1592 = dma.done.wait [#allocation3], 128  }
  0x13   :  { %1593 = vsyncadd [#allocation3], 4294967168 }
  0x14   :  { %1594 = dma.done.wait [#allocation6], 2112  }
  0x15   :  { %1595 = vsyncadd [#allocation6], 4294965184 }
  0x16   :  { %1596 = dma.done.wait [#allocation9], 10240  }
  0x17   :  { %1597 = vsyncadd [#allocation9], 4294957056  ;;  %v1001_v0 = vld [vmem:[#allocation5 + $0x60] sm:$0xf]  ;;  %v1353_v1 = vld [vmem:[#allocation5 + $0x6c] sm:$0xf0] }
  0x18   :  { %v1351_v2 = vld [vmem:[#allocation5 + $0x64] sm:$0xf]  ;;  %v1002_v3 = vor.u32 %v1353_v1, %v1001_v0  ;;  %v1003_v4 = vld [vmem:[#allocation5 + $0x70] sm:$0xf0]  ;;  %v985_v5 = vld [vmem:[#allocation5 + $0x40] sm:$0xf] }
  0x19   :  { %v1349_v6 = vld [vmem:[#allocation5 + $0x4c] sm:$0xf0]  ;;  %v1006_v7 = vor.u32 %v1351_v2, %v1003_v4  ;;  %v1347_v8 = vld [vmem:[#allocation5 + $0x44] sm:$0xf]  ;;  %v987_v9 = vld [vmem:[#allocation5 + $0x50] sm:$0xf0] }
  0x1a   :  { %218 = vmatpush.bf16.msra.mxu2 %v1002_v3  ;;  %v986_v10 = vor.u32 %v1349_v6, %v985_v5  ;;  %v990_v11 = vor.u32 %v1347_v8, %v987_v9  ;;  %v969_v12 = vld [vmem:[#allocation5 + $0x20] sm:$0xf]  ;;  %v1345_v13 = vld [vmem:[#allocation5 + $0x2c] sm:$0xf0]  ;;  %v1343_v14 = vld [vmem:[#allocation5 + $0x24] sm:$0xf] }
  0x1b   :  { %231 = vmatpush.bf16.msra.mxu3 %v1006_v7  ;;  %v971_v15 = vld [vmem:[#allocation5 + $0x30] sm:$0xf0]  ;;  %v970_v16 = vor.u32 %v1345_v13, %v969_v12  ;;  %v953_v18 = vld [vmem:[#allocation5] sm:$0xf]  ;;  %v1341_v19 = vld [vmem:[#allocation5 + $0xc] sm:$0xf0] }
  0x1c   :  { %v974_v17 = vor.u32 %v1343_v14, %v971_v15  ;;  %v1339_v20 = vld [vmem:[#allocation5 + $0x4] sm:$0xf]  ;;  %v955_v21 = vld [vmem:[#allocation5 + $0x10] sm:$0xf0]  ;;  %v1009_v22 = vld [vmem:[#allocation5 + $0x68] sm:$0xf]  ;;  %v954_v27 = vor.u32 %v1341_v19, %v953_v18 }
  0x1d   :  { %v1354_v23 = vld [vmem:[#allocation5 + $0x74] sm:$0xf0]  ;;  %v1352_v25 = vld [vmem:[#allocation5 + $0x6c] sm:$0xf]  ;;  %v1011_v26 = vld [vmem:[#allocation5 + $0x78] sm:$0xf0]  ;;  %v958_v32 = vor.u32 %v1339_v20, %v955_v21 }
  0x1e   :  { %219 = vmatpush.bf16.msra.mxu2 %v986_v10  ;;  %v102_v24 = vld [vmem:[#allocation2] sm:$0xff]  ;;  %v993_v28 = vld [vmem:[#allocation5 + $0x48] sm:$0xf]  ;;  %v1077_v29 = vld [vmem:[#allocation8 + $0x70] sm:$0xf]  ;;  %v1010_v33 = vor.u32 %v1354_v23, %v1009_v22  ;;  %v1014_v38 = vor.u32 %v1352_v25, %v1011_v26  ;;  %vm210_vm0 = vcmask 523264  }
  0x1f   :  { %232 = vmatpush.bf16.msra.mxu3 %v990_v11  ;;  %v1370_v30 = vld [vmem:[#allocation8 + $0x74] sm:$0xf0]  ;;  %v1141_v31 = vld [vmem:[#allocation8 + $0xf0] sm:$0xf]  ;;  %v1069_v36 = vld [vmem:[#allocation8 + $0x60] sm:$0xf]  ;;  %v1667_v43 = vpack.c.bf16 %v102_v24, %v102_v24 }
  0x20   :  { %v1078_v34 = vor.u32 %v1370_v30, %v1077_v29  ;;  %v1386_v35 = vld [vmem:[#allocation8 + $0xf4] sm:$0xf0]  ;;  %v1368_v37 = vld [vmem:[#allocation8 + $0x64] sm:$0xf0]  ;;  %v1350_v39 = vld [vmem:[#allocation5 + $0x54] sm:$0xf0] }
  0x21   :  { %v1142_v40 = vor.u32 %v1386_v35, %v1141_v31  ;;  %v1133_v41 = vld [vmem:[#allocation8 + $0xe0] sm:$0xf]  ;;  %v1384_v42 = vld [vmem:[#allocation8 + $0xe4] sm:$0xf0]  ;;  %v995_v45 = vld [vmem:[#allocation5 + $0x58] sm:$0xf0]  ;;  %v1070_v46 = vor.u32 %v1368_v37, %v1069_v36  ;;  %v994_v50 = vor.u32 %v1350_v39, %v993_v28 }
  0x22   :  { %220 = vmatpush.bf16.msra.mxu2 %v970_v16  ;;  %v1348_v44 = vld [vmem:[#allocation5 + $0x4c] sm:$0xf]  ;;  %664 = vmatpush.bf16.msra.mxu0 %v1078_v34  ;;  %v1134_v47 = vor.u32 %v1384_v42, %v1133_v41  ;;  %v1061_v48 = vld [vmem:[#allocation8 + $0x50] sm:$0xf]  ;;  %v1366_v49 = vld [vmem:[#allocation8 + $0x54] sm:$0xf0] }
  0x23   :  { %233 = vmatpush.bf16.msra.mxu3 %v974_v17  ;;  %677 = vmatpush.bf16.msra.mxu1 %v1142_v40  ;;  %v1125_v51 = vld [vmem:[#allocation8 + $0xd0] sm:$0xf]  ;;  %v1382_v52 = vld [vmem:[#allocation8 + $0xd4] sm:$0xf0]  ;;  %v998_v53 = vor.u32 %v1348_v44, %v995_v45  ;;  %v977_v54 = vld [vmem:[#allocation5 + $0x28] sm:$0xf]  ;;  %v1062_v58 = vor.u32 %v1366_v49, %v1061_v48 }
  0x24   :  { %v1346_v55 = vld [vmem:[#allocation5 + $0x34] sm:$0xf0]  ;;  %v1344_v56 = vld [vmem:[#allocation5 + $0x2c] sm:$0xf]  ;;  %v979_v57 = vld [vmem:[#allocation5 + $0x38] sm:$0xf0]  ;;  %v1126_v59 = vor.u32 %v1382_v52, %v1125_v51 }
  0x25   :  { %v1053_v60 = vld [vmem:[#allocation8 + $0x40] sm:$0xf]  ;;  %v1364_v61 = vld [vmem:[#allocation8 + $0x44] sm:$0xf0]  ;;  %v978_v62 = vor.u32 %v1346_v55, %v977_v54  ;;  %v961_v63 = vld [vmem:[#allocation5 + $0x8] sm:$0xf]  ;;  %v982_v2 = vor.u32 %v1344_v56, %v979_v57 }
  0x26   :  { %221 = vmatpush.bf16.msra.mxu2 %v954_v27  ;;  %665 = vmatpush.bf16.msra.mxu0 %v1070_v46  ;;  %v1117_v0 = vld [vmem:[#allocation8 + $0xc0] sm:$0xf]  ;;  %v1380_v1 = vld [vmem:[#allocation8 + $0xc4] sm:$0xf0]  ;;  %v1342_v3 = vld [vmem:[#allocation5 + $0x14] sm:$0xf0]  ;;  %v1054_v6 = vor.u32 %v1364_v61, %v1053_v60 }
  0x27   :  { %234 = vmatpush.bf16.msra.mxu3 %v958_v32  ;;  %678 = vmatpush.bf16.msra.mxu1 %v1134_v47  ;;  %v1340_v4 = vld [vmem:[#allocation5 + $0xc] sm:$0xf]  ;;  %v963_v5 = vld [vmem:[#allocation5 + $0x18] sm:$0xf0]  ;;  %v1045_v7 = vld [vmem:[#allocation8 + $0x30] sm:$0xf]  ;;  %v1118_v10 = vor.u32 %v1380_v1, %v1117_v0  ;;  %v962_v14 = vor.u32 %v1342_v3, %v961_v63 }
  0x28   :  { %v1205_v8 = vld [vmem:[#allocation8 + $0x170] sm:$0xf]  ;;  %v1402_v9 = vld [vmem:[#allocation8 + $0x174] sm:$0xf0]  ;;  %v966_v17 = vor.u32 %v1340_v4, %v963_v5  ;;  %v1197_v21 = vld [vmem:[#allocation8 + $0x160] sm:$0xf] }
  0x29   :  { %1015 = vmatmul.msk.bf16.vlgmr.msra.gmra.mxu2 %vm210_vm0, %v1667_v43  ;;  %v1362_v11 = vld [vmem:[#allocation8 + $0x34] sm:$0xf0]  ;;  %v1269_v12 = vld [vmem:[#allocation8 + $0x1f0] sm:$0xf]  ;;  %v1206_v18 = vor.u32 %v1402_v9, %v1205_v8  ;;  %v1400_v22 = vld [vmem:[#allocation8 + $0x164] sm:$0xf0] }
  0x2a   :  { %244 = vmatpush.bf16.msrb.mxu2 %v1010_v33  ;;  %1016 = vmatmul.msk.bf16.vlgmr.msra.gmra.mxu3 %vm210_vm0, %v1667_v43  ;;  %v1418_v13 = vld [vmem:[#allocation8 + $0x1f4] sm:$0xf0]  ;;  %v1109_v15 = vld [vmem:[#allocation8 + $0xb0] sm:$0xf]  ;;  %v1046_v19 = vor.u32 %v1362_v11, %v1045_v7  ;;  %v1037_v24 = vld [vmem:[#allocation8 + $0x20] sm:$0xf]  ;;  %v1198_v28 = vor.u32 %v1400_v22, %v1197_v21 }
  0x2b   :  { %257 = vmatpush.bf16.msrb.mxu3 %v1014_v38  ;;  %666 = vmatpush.bf16.msra.mxu0 %v1062_v58  ;;  %v1378_v16 = vld [vmem:[#allocation8 + $0xb4] sm:$0xf0]  ;;  %v1270_v20 = vor.u32 %v1418_v13, %v1269_v12  ;;  %v1360_v25 = vld [vmem:[#allocation8 + $0x24] sm:$0xf0]  ;;  %v1101_v26 = vld [vmem:[#allocation8 + $0xa0] sm:$0xf] }
  0x2c   :  { %679 = vmatpush.bf16.msra.mxu1 %v1126_v59  ;;  %v1110_v23 = vor.u32 %v1378_v16, %v1109_v15  ;;  %v1376_v27 = vld [vmem:[#allocation8 + $0xa4] sm:$0xf0]  ;;  %v1261_v29 = vld [vmem:[#allocation8 + $0x1e0] sm:$0xf]  ;;  %v1038_v31 = vor.u32 %v1360_v25, %v1037_v24  ;;  %v1189_v32 = vld [vmem:[#allocation8 + $0x150] sm:$0xf] }
  0x2d   :  { %v1416_v30 = vld [vmem:[#allocation8 + $0x1e4] sm:$0xf0]  ;;  %v1398_v33 = vld [vmem:[#allocation8 + $0x154] sm:$0xf0]  ;;  %v1102_v34 = vor.u32 %v1376_v27, %v1101_v26  ;;  %v1029_v35 = vld [vmem:[#allocation8 + $0x10] sm:$0xf] }
  0x2e   :  { %245 = vmatpush.bf16.msrb.mxu2 %v994_v50  ;;  %v1358_v36 = vld [vmem:[#allocation8 + $0x14] sm:$0xf0]  ;;  %v1262_v37 = vor.u32 %v1416_v30, %v1261_v29  ;;  %v1093_v38 = vld [vmem:[#allocation8 + $0x90] sm:$0xf]  ;;  %v1190_v40 = vor.u32 %v1398_v33, %v1189_v32  ;;  %v1021_v45 = vld [vmem:[#allocation8] sm:$0xf] }
  0x2f   :  { %258 = vmatpush.bf16.msrb.mxu3 %v998_v53  ;;  %667 = vmatpush.bf16.msra.mxu0 %v1054_v6  ;;  %v1374_v39 = vld [vmem:[#allocation8 + $0x94] sm:$0xf0]  ;;  %v1253_v41 = vld [vmem:[#allocation8 + $0x1d0] sm:$0xf]  ;;  %v1030_v44 = vor.u32 %v1358_v36, %v1029_v35  ;;  %v1181_v46 = vld [vmem:[#allocation8 + $0x140] sm:$0xf] }
  0x30   :  { %680 = vmatpush.bf16.msra.mxu1 %v1118_v10  ;;  %v1414_v42 = vld [vmem:[#allocation8 + $0x1d4] sm:$0xf0]  ;;  %v1396_v47 = vld [vmem:[#allocation8 + $0x144] sm:$0xf0]  ;;  %v1094_v48 = vor.u32 %v1374_v39, %v1093_v38  ;;  %v1085_v50 = vld [vmem:[#allocation8 + $0x80] sm:$0xf] }
  0x31   :  { %v1356_v49 = vld [vmem:[#allocation8 + $0x4] sm:$0xf0]  ;;  %v1254_v52 = vor.u32 %v1414_v42, %v1253_v41  ;;  %v1245_v53 = vld [vmem:[#allocation8 + $0x1c0] sm:$0xf]  ;;  %v1369_v54 = vld [vmem:[#allocation8 + $0x74] sm:$0xf]  ;;  %v1182_v56 = vor.u32 %v1396_v47, %v1181_v46 }
  0x32   :  { %246 = vmatpush.bf16.msrb.mxu2 %v978_v62  ;;  %v1372_v51 = vld [vmem:[#allocation8 + $0x84] sm:$0xf0]  ;;  %v1079_v55 = vld [vmem:[#allocation8 + $0x78] sm:$0xf0]  ;;  %v1385_v58 = vld [vmem:[#allocation8 + $0xf4] sm:$0xf]  ;;  %v1022_v60 = vor.u32 %v1356_v49, %v1021_v45 }
  0x33   :  { %259 = vmatpush.bf16.msrb.mxu3 %v982_v2  ;;  %668 = vmatpush.bf16.msra.mxu0 %v1046_v19  ;;  %v1412_v57 = vld [vmem:[#allocation8 + $0x1c4] sm:$0xf0]  ;;  %v1143_v59 = vld [vmem:[#allocation8 + $0xf8] sm:$0xf0]  ;;  %v1173_v61 = vld [vmem:[#allocation8 + $0x130] sm:$0xf]  ;;  %v1082_v63 = vor.u32 %v1369_v54, %v1079_v55 }
  0x34   :  { %681 = vmatpush.bf16.msra.mxu1 %v1110_v23  ;;  %v1394_v62 = vld [vmem:[#allocation8 + $0x134] sm:$0xf0]  ;;  %v1246_v0 = vor.u32 %v1412_v57, %v1245_v53  ;;  %v1146_v1 = vor.u32 %v1385_v58, %v1143_v59  ;;  %v1237_v2 = vld [vmem:[#allocation8 + $0x1b0] sm:$0xf]  ;;  %v1367_v3 = vld [vmem:[#allocation8 + $0x64] sm:$0xf] }
  0x35   :  { %v1071_v4 = vld [vmem:[#allocation8 + $0x68] sm:$0xf0]  ;;  %v1174_v5 = vor.u32 %v1394_v62, %v1173_v61  ;;  %v1410_v6 = vld [vmem:[#allocation8 + $0x1b4] sm:$0xf0]  ;;  %v1383_v7 = vld [vmem:[#allocation8 + $0xe4] sm:$0xf] }
  0x36   :  { %247 = vmatpush.bf16.msrb.mxu2 %v962_v14  ;;  %v1135_v8 = vld [vmem:[#allocation8 + $0xe8] sm:$0xf0]  ;;  %v1165_v9 = vld [vmem:[#allocation8 + $0x120] sm:$0xf]  ;;  %v1392_v10 = vld [vmem:[#allocation8 + $0x124] sm:$0xf0]  ;;  %v1074_v11 = vor.u32 %v1367_v3, %v1071_v4  ;;  %v1238_v12 = vor.u32 %v1410_v6, %v1237_v2 }
  0x37   :  { %260 = vmatpush.bf16.msrb.mxu3 %v966_v17  ;;  %669 = vmatpush.bf16.msra.mxu0 %v1038_v31  ;;  %v1138_v13 = vor.u32 %v1383_v7, %v1135_v8  ;;  %v1166_v14 = vor.u32 %v1392_v10, %v1165_v9  ;;  %v1229_v15 = vld [vmem:[#allocation8 + $0x1a0] sm:$0xf]  ;;  %v1408_v16 = vld [vmem:[#allocation8 + $0x1a4] sm:$0xf0]  ;;  %v1063_v19 = vld [vmem:[#allocation8 + $0x58] sm:$0xf0] }
  0x38   :  { %682 = vmatpush.bf16.msra.mxu1 %v1102_v34  ;;  %v1230_v17 = vor.u32 %v1408_v16, %v1229_v15  ;;  %v1127_v22 = vld [vmem:[#allocation8 + $0xd8] sm:$0xf0]  ;;  %v1157_v24 = vld [vmem:[#allocation8 + $0x110] sm:$0xf]  ;;  %v1390_v25 = vld [vmem:[#allocation8 + $0x114] sm:$0xf0] }
  0x39   :  { %1017 = vmatmul.msk.bf16.vlgmr.msrb.gmra.mxu2 %vm210_vm0, %v1667_v43  ;;  %v1221_v26 = vld [vmem:[#allocation8 + $0x190] sm:$0xf]  ;;  %v1158_v27 = vor.u32 %v1390_v25, %v1157_v24  ;;  %v1363_v29 = vld [vmem:[#allocation8 + $0x44] sm:$0xf]  ;;  %v1055_v30 = vld [vmem:[#allocation8 + $0x48] sm:$0xf0] }
  0x3a   :  { %690 = vmatpush.bf16.msra.mxu2 %v1206_v18  ;;  %1018 = vmatmul.msk.bf16.vlgmr.msrb.gmra.mxu3 %vm210_vm0, %v1667_v43  ;;  %v1086_v43 = vor.u32 %v1372_v51, %v1085_v50  ;;  %v1365_v18 = vld [vmem:[#allocation8 + $0x54] sm:$0xf]  ;;  %v1058_v32 = vor.u32 %v1363_v29, %v1055_v30  ;;  %v1379_v33 = vld [vmem:[#allocation8 + $0xc4] sm:$0xf]  ;;  %v1119_v34 = vld [vmem:[#allocation8 + $0xc8] sm:$0xf0] }
  0x3b   :  { %703 = vmatpush.bf16.msra.mxu3 %v1270_v20  ;;  %670 = vmatpush.bf16.msra.mxu0 %v1030_v44  ;;  %v1381_v20 = vld [vmem:[#allocation8 + $0xd4] sm:$0xf]  ;;  %v1066_v21 = vor.u32 %v1365_v18, %v1063_v19  ;;  %v1122_v35 = vor.u32 %v1379_v33, %v1119_v34  ;;  %v1149_v36 = vld [vmem:[#allocation8 + $0x100] sm:$0xf]  ;;  %v1047_v42 = vld [vmem:[#allocation8 + $0x38] sm:$0xf0] }
  0x3c   :  { %683 = vmatpush.bf16.msra.mxu1 %v1094_v48  ;;  %v1130_v23 = vor.u32 %v1381_v20, %v1127_v22  ;;  %v1213_v38 = vld [vmem:[#allocation8 + $0x180] sm:$0xf]  ;;  %v1361_v41 = vld [vmem:[#allocation8 + $0x34] sm:$0xf]  ;;  %v1111_v47 = vld [vmem:[#allocation8 + $0xb8] sm:$0xf0] }
  0x3d   :  { %v1050_v45 = vor.u32 %v1361_v41, %v1047_v42  ;;  %v1377_v46 = vld [vmem:[#allocation8 + $0xb4] sm:$0xf]  ;;  %v1207_v50 = vld [vmem:[#allocation8 + $0x178] sm:$0xf0]  ;;  %v1359_v55 = vld [vmem:[#allocation8 + $0x24] sm:$0xf] }
  0x3e   :  { %691 = vmatpush.bf16.msra.mxu2 %v1198_v28  ;;  %v1406_v28 = vld [vmem:[#allocation8 + $0x194] sm:$0xf0]  ;;  %v1401_v48 = vld [vmem:[#allocation8 + $0x174] sm:$0xf]  ;;  %v1114_v49 = vor.u32 %v1377_v46, %v1111_v47  ;;  %v1375_v57 = vld [vmem:[#allocation8 + $0xa4] sm:$0xf] }
  0x3f   :  { %704 = vmatpush.bf16.msra.mxu3 %v1262_v37  ;;  %671 = vmatpush.bf16.msra.mxu0 %v1022_v60  ;;  %v1222_v31 = vor.u32 %v1406_v28, %v1221_v26  ;;  %v1388_v37 = vld [vmem:[#allocation8 + $0x104] sm:$0xf0]  ;;  %v1417_v51 = vld [vmem:[#allocation8 + $0x1f4] sm:$0xf]  ;;  %v1210_v53 = vor.u32 %v1401_v48, %v1207_v50  ;;  %v1103_v59 = vld [vmem:[#allocation8 + $0xa8] sm:$0xf0] }
  0x40   :  { %684 = vmatpush.bf16.msra.mxu1 %v1086_v43  ;;  %v1150_v39 = vor.u32 %v1388_v37, %v1149_v36  ;;  %v1399_v60 = vld [vmem:[#allocation8 + $0x164] sm:$0xf]  ;;  %v1199_v61 = vld [vmem:[#allocation8 + $0x168] sm:$0xf0]  ;;  %v1106_v62 = vor.u32 %v1375_v57, %v1103_v59  ;;  %v1357_v2 = vld [vmem:[#allocation8 + $0x14] sm:$0xf] }
  0x41   :  { %v1202_v43 = vor.u32 %v1399_v60, %v1199_v61  ;;  %v1031_v3 = vld [vmem:[#allocation8 + $0x18] sm:$0xf0]  ;;  %v1373_v4 = vld [vmem:[#allocation8 + $0x94] sm:$0xf]  ;;  %v1023_v15 = vld [vmem:[#allocation8 + $0x8] sm:$0xf0] }
  0x42   :  { %692 = vmatpush.bf16.msra.mxu2 %v1190_v40  ;;  %v1404_v40 = vld [vmem:[#allocation8 + $0x184] sm:$0xf0]  ;;  %v1095_v6 = vld [vmem:[#allocation8 + $0x98] sm:$0xf0]  ;;  %v1397_v7 = vld [vmem:[#allocation8 + $0x154] sm:$0xf] }
  0x43   :  { %705 = vmatpush.bf16.msra.mxu3 %v1254_v52  ;;  %716 = vmatpush.bf16.msrb.mxu0 %v1082_v63  ;;  %v1214_v44 = vor.u32 %v1404_v40, %v1213_v38  ;;  %v1271_v52 = vld [vmem:[#allocation8 + $0x1f8] sm:$0xf0]  ;;  %v1415_v63 = vld [vmem:[#allocation8 + $0x1e4] sm:$0xf]  ;;  %v1098_v9 = vor.u32 %v1373_v4, %v1095_v6  ;;  %v1087_v18 = vld [vmem:[#allocation8 + $0x88] sm:$0xf0] }
  0x44   :  { %729 = vmatpush.bf16.msrb.mxu1 %v1146_v1  ;;  %v1274_v54 = vor.u32 %v1417_v51, %v1271_v52  ;;  %v1191_v8 = vld [vmem:[#allocation8 + $0x158] sm:$0xf0]  ;;  %v1371_v16 = vld [vmem:[#allocation8 + $0x84] sm:$0xf]  ;;  %v1183_v20 = vld [vmem:[#allocation8 + $0x148] sm:$0xf0] }
  0x45   :  { %v1194_v10 = vor.u32 %v1397_v7, %v1191_v8  ;;  %v1395_v19 = vld [vmem:[#allocation8 + $0x144] sm:$0xf]  ;;  %v1247_v24 = vld [vmem:[#allocation8 + $0x1c8] sm:$0xf0]  ;;  %v1393_v26 = vld [vmem:[#allocation8 + $0x134] sm:$0xf] }
  0x46   :  { %693 = vmatpush.bf16.msra.mxu2 %v1182_v56  ;;  %v1039_v56 = vld [vmem:[#allocation8 + $0x28] sm:$0xf0]  ;;  %v1186_v22 = vor.u32 %v1395_v19, %v1183_v20  ;;  %v1409_v28 = vld [vmem:[#allocation8 + $0x1b4] sm:$0xf]  ;;  %v1239_v30 = vld [vmem:[#allocation8 + $0x1b8] sm:$0xf0] }
  0x47   :  { %706 = vmatpush.bf16.msra.mxu3 %v1246_v0  ;;  %717 = vmatpush.bf16.msrb.mxu0 %v1074_v11  ;;  %v1042_v58 = vor.u32 %v1359_v55, %v1039_v56  ;;  %v1263_v0 = vld [vmem:[#allocation8 + $0x1e8] sm:$0xf0]  ;;  %v1413_v11 = vld [vmem:[#allocation8 + $0x1d4] sm:$0xf]  ;;  %v1407_v34 = vld [vmem:[#allocation8 + $0x1a4] sm:$0xf] }
  0x48   :  { %730 = vmatpush.bf16.msrb.mxu1 %v1138_v13  ;;  %v1266_v1 = vor.u32 %v1415_v63, %v1263_v0  ;;  %v1167_v33 = vld [vmem:[#allocation8 + $0x128] sm:$0xf0]  ;;  %v1159_v40 = vld [vmem:[#allocation8 + $0x118] sm:$0xf0]  ;;  %v1405_v41 = vld [vmem:[#allocation8 + $0x194] sm:$0xf] }
  0x49   :  { %v1231_v36 = vld [vmem:[#allocation8 + $0x1a8] sm:$0xf0]  ;;  %v1223_v42 = vld [vmem:[#allocation8 + $0x198] sm:$0xf0]  ;;  %s1611_s30 = smov [#allocation11]   ;;  %s939_s11 = sshll.u32 %s1693_s7, 4  ;;  %s940_s11 = int_to_ptr.hbm [resolvable:$true] %s939_s11 }
  0x4a   :  { %694 = vmatpush.bf16.msra.mxu2 %v1174_v5  ;;  %v1034_v5 = vor.u32 %v1357_v2, %v1031_v3  ;;  %v1234_v38 = vor.u32 %v1407_v34, %v1231_v36  ;;  %v1226_v47 = vor.u32 %v1405_v41, %v1223_v42  ;;  %v1151_v50 = vld [vmem:[#allocation8 + $0x108] sm:$0xf0]  ;;  %s937_s8 = sshll.u32 %s1611_s30, 4  ;;  %s938_s8 = int_to_ptr.vmem [resolvable:$true] %s937_s8 }
  0x4b   :  { %707 = vmatpush.bf16.msra.mxu3 %v1238_v12  ;;  %718 = vmatpush.bf16.msrb.mxu0 %v1066_v21  ;;  %v1255_v12 = vld [vmem:[#allocation8 + $0x1d8] sm:$0xf0]  ;;  %v1090_v21 = vor.u32 %v1371_v16, %v1087_v18  ;;  %v1433_v18 = vld [vmem:[#allocation10 + $0x70] sm:$0xff]  ;;  %v1420_v19 = vld [vmem:[#allocation10 + $0x8] sm:$0xff] }
  0x4c   :  { %731 = vmatpush.bf16.msrb.mxu1 %v1130_v23  ;;  %v1258_v13 = vor.u32 %v1413_v11, %v1255_v12  ;;  %v1411_v23 = vld [vmem:[#allocation8 + $0x1c4] sm:$0xf]  ;;  %v1426_v11 = vld [vmem:[#allocation10 + $0x38] sm:$0xff]  ;;  %v1425_v12 = vld [vmem:[#allocation10 + $0x30] sm:$0xff] }
  0x4d   :  { %v1250_v25 = vor.u32 %v1411_v23, %v1247_v24  ;;  %v1434_v16 = vld [vmem:[#allocation10 + $0x78] sm:$0xff]  ;;  %v1432_v20 = vld [vmem:[#allocation10 + $0x68] sm:$0xff] }
  0x4e   :  { %695 = vmatpush.bf16.msra.mxu2 %v1166_v14  ;;  %v1355_v14 = vld [vmem:[#allocation8 + $0x4] sm:$0xf]  ;;  %v1430_v23 = vld [vmem:[#allocation10 + $0x58] sm:$0xff] }
  0x4f   :  { %708 = vmatpush.bf16.msra.mxu3 %v1230_v17  ;;  %719 = vmatpush.bf16.msrb.mxu0 %v1058_v32  ;;  %v1026_v17 = vor.u32 %v1355_v14, %v1023_v15  ;;  %v1391_v32 = vld [vmem:[#allocation8 + $0x124] sm:$0xf]  ;;  %v1422_v15 = vld [vmem:[#allocation10 + $0x18] sm:$0xff] }
  0x50   :  { %732 = vmatpush.bf16.msrb.mxu1 %v1122_v35  ;;  %v120_v35 = vld [vmem:[#allocation7] sm:$0xf]  ;;  %v1170_v37 = vor.u32 %v1391_v32, %v1167_v33  ;;  %v1423_v14 = vld [vmem:[#allocation10 + $0x20] sm:$0xff] }
  0x51   :  { %v124_v63 = vperm.slane %v120_v35, 2  ;;  %v125_v0 = vperm.slane %v120_v35, 3 }
  0x52   :  { %696 = vmatpush.bf16.msra.mxu2 %v1158_v27  ;;  %v1175_v27 = vld [vmem:[#allocation8 + $0x138] sm:$0xf0] }
  0x53   :  { %709 = vmatpush.bf16.msra.mxu3 %v1222_v31  ;;  %720 = vmatpush.bf16.msrb.mxu0 %v1050_v45  ;;  %v1178_v29 = vor.u32 %v1393_v26, %v1175_v27  ;;  %v1242_v31 = vor.u32 %v1409_v28, %v1239_v30  ;;  %v123_v45 = vperm.slane %v120_v35, 1  ;;  %v1429_v26 = vld [vmem:[#allocation10 + $0x50] sm:$0xff]  ;;  %v1428_v27 = vld [vmem:[#allocation10 + $0x48] sm:$0xff] }
  0x54   :  { %733 = vmatpush.bf16.msrb.mxu1 %v1114_v49  ;;  %v1387_v49 = vld [vmem:[#allocation8 + $0x104] sm:$0xf]  ;;  %v338_v30 = vld [vmem:[%s1690_s4] sm:$0x3] }
  0x55   :  { %v1154_v57 = vor.u32 %v1387_v49, %v1151_v50  ;;  %v340_v32 = vperm.slane %v338_v30, 0 }
  0x56   :  { %697 = vmatpush.bf16.msra.mxu2 %v1150_v39  ;;  %v1389_v39 = vld [vmem:[#allocation8 + $0x114] sm:$0xf] }
  0x57   :  { %710 = vmatpush.bf16.msra.mxu3 %v1214_v44  ;;  %721 = vmatpush.bf16.msrb.mxu0 %v1042_v58  ;;  %v122_v44 = vperm.slane %v120_v35, 0  ;;  %v1162_v46 = vor.u32 %v1389_v39, %v1159_v40 }
  0x58   :  { %734 = vmatpush.bf16.msrb.mxu1 %v1106_v62 }
  0x5a   :  { %742 = vmatpush.bf16.msrb.mxu2 %v1210_v53  ;;  %v1403_v53 = vld [vmem:[#allocation8 + $0x184] sm:$0xf] }
  0x5b   :  { %755 = vmatpush.bf16.msrb.mxu3 %v1274_v54  ;;  %722 = vmatpush.bf16.msrb.mxu0 %v1034_v5  ;;  %v1215_v54 = vld [vmem:[#allocation8 + $0x188] sm:$0xf0] }
  0x5c   :  { %735 = vmatpush.bf16.msrb.mxu1 %v1098_v9  ;;  %v1218_v59 = vor.u32 %v1403_v53, %v1215_v54 }
  0x5e   :  { %743 = vmatpush.bf16.msrb.mxu2 %v1202_v43 }
  0x5f   :  { %756 = vmatpush.bf16.msrb.mxu3 %v1266_v1  ;;  %723 = vmatpush.bf16.msrb.mxu0 %v1026_v17  ;;  %v1421_v17 = vld [vmem:[#allocation10 + $0x10] sm:$0xff] }
  0x60   :  { %736 = vmatpush.bf16.msrb.mxu1 %v1090_v21  ;;  %v1419_v21 = vld [vmem:[#allocation10] sm:$0xff] }
  0x62   :  { %744 = vmatpush.bf16.msrb.mxu2 %v1194_v10 }
  0x63   :  { %757 = vmatpush.bf16.msrb.mxu3 %v1258_v13  ;;  %v1424_v13 = vld [vmem:[#allocation10 + $0x28] sm:$0xff] }
  0x66   :  { %745 = vmatpush.bf16.msrb.mxu2 %v1186_v22  ;;  %v1431_v22 = vld [vmem:[#allocation10 + $0x60] sm:$0xff] }
  0x67   :  { %758 = vmatpush.bf16.msrb.mxu3 %v1250_v25 }
  0x6a   :  { %746 = vmatpush.bf16.msrb.mxu2 %v1178_v29 }
  0x6b   :  { %759 = vmatpush.bf16.msrb.mxu3 %v1242_v31  ;;  %v1427_v31 = vld [vmem:[#allocation10 + $0x40] sm:$0xff] }
  0x6e   :  { %747 = vmatpush.bf16.msrb.mxu2 %v1170_v37 }
  0x6f   :  { %760 = vmatpush.bf16.msrb.mxu3 %v1234_v38 }
  0x72   :  { %748 = vmatpush.bf16.msrb.mxu2 %v1162_v46 }
  0x73   :  { %761 = vmatpush.bf16.msrb.mxu3 %v1226_v47 }
  0x76   :  { %749 = vmatpush.bf16.msrb.mxu2 %v1154_v57 }
  0x77   :  { %762 = vmatpush.bf16.msrb.mxu3 %v1218_v59 }
  0xac   :  { %v223_v48 = vpop.f32.mrf.mxu2 }
  0xad   :  { %v224_v51 = vadd.f32 %v223_v48, %v122_v44  ;;  %v236_v52 = vpop.f32.mrf.mxu3 }
  0xae   :  { %v237_v55 = vadd.f32 %v236_v52, %v123_v45  ;;  %v341_v45 = vperm.slane %v338_v30, 1 }
  0xaf   :  { %v266_v56 = vmax.f32 %v224_v51, 0.0 }
  0xb0   :  { %v267_v58 = vmax.f32 %v237_v55, 0.0 }
  0xb1   :  { %v270_v60 = vpack.c.bf16 %v266_v56, %v266_v56 }
  0xb2   :  { %v271_v61 = vpack.c.bf16 %v267_v58, %v267_v58 }
  0xb3   :  { %672 = vmatmul.bf16.vlgmr.msra.gmra.mxu0 %v270_v60 }
  0xb4   :  { %685 = vmatmul.bf16.vlgmr.msra.gmra.mxu1 %v271_v61  ;;  %v225_v62 = vpop.f32.mrf.mxu2  ;;  %904 = vmatpush.bf16.msra.mxu0 %v1426_v11 }
  0xb5   :  { %v238_v43 = vpop.f32.mrf.mxu3  ;;  %917 = vmatpush.bf16.msra.mxu1 %v1434_v16 }
  0xb8   :  { %905 = vmatpush.bf16.msra.mxu0 %v1425_v12 }
  0xb9   :  { %918 = vmatpush.bf16.msra.mxu1 %v1433_v18 }
  0xbc   :  { %v249_v1 = vpop.f32.mrf.mxu2  ;;  %906 = vmatpush.bf16.msra.mxu0 %v1424_v13 }
  0xbd   :  { %v250_v2 = vadd.f32 %v249_v1, %v124_v63  ;;  %v262_v3 = vpop.f32.mrf.mxu3  ;;  %919 = vmatpush.bf16.msra.mxu1 %v1432_v20 }
  0xbe   :  { %v263_v4 = vadd.f32 %v262_v3, %v125_v0 }
  0xbf   :  { %v268_v5 = vmax.f32 %v250_v2, 0.0 }
  0xc0   :  { %v269_v6 = vmax.f32 %v263_v4, 0.0  ;;  %907 = vmatpush.bf16.msra.mxu0 %v1423_v14 }
  0xc1   :  { %v272_v7 = vpack.c.bf16 %v268_v5, %v268_v5  ;;  %920 = vmatpush.bf16.msra.mxu1 %v1431_v22 }
  0xc2   :  { %v273_v8 = vpack.c.bf16 %v269_v6, %v269_v6 }
  0xc3   :  { %698 = vmatmul.bf16.vlgmr.msra.gmra.mxu2 %v272_v7  ;;  %724 = vmatmul.bf16.vlgmr.msrb.gmra.mxu0 %v270_v60 }
  0xc4   :  { %711 = vmatmul.bf16.vlgmr.msra.gmra.mxu3 %v273_v8  ;;  %737 = vmatmul.bf16.vlgmr.msrb.gmra.mxu1 %v271_v61  ;;  %v251_v9 = vpop.f32.mrf.mxu2  ;;  %v1447_v61 = vld [vmem:[%s1692_s6] ss:$0 sm:$0xff] }
  0xc5   :  { %v264_v10 = vpop.f32.mrf.mxu3  ;;  %908 = vmatpush.bf16.msra.mxu0 %v1422_v15  ;;  %921 = vmatpush.bf16.msra.mxu1 %v1430_v23 }
  0xc9   :  { %909 = vmatpush.bf16.msra.mxu0 %v1421_v17  ;;  %922 = vmatpush.bf16.msra.mxu1 %v1429_v26 }
  0xcd   :  { %910 = vmatpush.bf16.msra.mxu0 %v1420_v19  ;;  %923 = vmatpush.bf16.msra.mxu1 %v1428_v27 }
  0xd1   :  { %911 = vmatpush.bf16.msra.mxu0 %v1419_v21  ;;  %924 = vmatpush.bf16.msra.mxu1 %v1427_v31 }
  0xd3   :  { %750 = vmatmul.bf16.vlgmr.msrb.gmra.mxu2 %v272_v7 }
  0xd4   :  { %763 = vmatmul.bf16.vlgmr.msrb.gmra.mxu3 %v273_v8 }
 0x130   :  { %v673_v24 = vpop.f32.mrf.mxu0 }
 0x131   :  { %v686_v25 = vpop.f32.mrf.mxu1  ;;  %v674_v34 = vadd.f32 %v673_v24, %v340_v32 }
 0x133   :  { %v687_v36 = vadd.f32 %v686_v25, %v674_v34 }
 0x138   :  { %v675_v28 = vpop.f32.mrf.mxu0 }
 0x139   :  { %v688_v29 = vpop.f32.mrf.mxu1 }
 0x140   :  { %v725_v33 = vpop.f32.mrf.mxu0 }
 0x141   :  { %v738_v35 = vpop.f32.mrf.mxu1  ;;  %v726_v49 = vadd.f32 %v725_v33, %v341_v45 }
 0x143   :  { %v739_v50 = vadd.f32 %v738_v35, %v726_v49 }
 0x146   :  { %v699_v37 = vpop.f32.mrf.mxu2 }
 0x147   :  { %v700_v38 = vadd.f32 %v699_v37, %v687_v36  ;;  %v712_v39 = vpop.f32.mrf.mxu3 }
 0x148   :  { %v727_v40 = vpop.f32.mrf.mxu0 }
 0x149   :  { %v713_v41 = vadd.f32 %v712_v39, %v700_v38  ;;  %v740_v42 = vpop.f32.mrf.mxu1 }
 0x14b   :  { %v768_v44 = vmax.f32 %v713_v41, 0.0 }
 0x14d   :  { %v770_v46 = vpack.c.bf16 %v768_v44, %v768_v44 }
 0x14e   :  { %v701_v47 = vpop.f32.mrf.mxu2 }
 0x14f   :  { %v714_v48 = vpop.f32.mrf.mxu3  ;;  %912 = vmatmul.bf16.vlgmr.msra.gmra.mxu0 %v770_v46 }
 0x156   :  { %v751_v51 = vpop.f32.mrf.mxu2 }
 0x157   :  { %v752_v52 = vadd.f32 %v751_v51, %v739_v50  ;;  %v764_v53 = vpop.f32.mrf.mxu3 }
 0x159   :  { %v765_v54 = vadd.f32 %v764_v53, %v752_v52 }
 0x15b   :  { %v769_v55 = vmax.f32 %v765_v54, 0.0 }
 0x15d   :  { %v771_v56 = vpack.c.bf16 %v769_v55, %v769_v55 }
 0x15e   :  { %v753_v57 = vpop.f32.mrf.mxu2 }
 0x15f   :  { %v766_v58 = vpop.f32.mrf.mxu3  ;;  %925 = vmatmul.bf16.vlgmr.msra.gmra.mxu1 %v771_v56 }
 0x1cc   :  { %v913_v59 = vpop.f32.mrf.mxu0 }
 0x1cd   :  { %v914_v62 = vadd.f32 %v1447_v61, %v913_v59 }
 0x1d4   :  { %v915_v60 = vpop.f32.mrf.mxu0 }
 0x1dc   :  { %v926_v43 = vpop.f32.mrf.mxu1 }
 0x1dd   :  { %v927_v63 = vadd.f32 %v926_v43, %v914_v62 }
 0x1df   :  { %v930_v0 = vpack.c.bf16 %v927_v63, %v927_v63 }
 0x1e1   :  { %931 = vst [vmem:[#allocation11] sm:$0xf] %v930_v0 }
 0x1e2   :  { %942 = dma.vmem_to_hbm [thread:$0]  %s938_s8, 64, %s940_s11, [#allocation4]  }
 0x1e4   :  { %v928_v1 = vpop.f32.mrf.mxu1 }
 0x1e5   :  { %1598 = dma.done.wait [#allocation4], 64  }
 0x1e6   :  { %1599 = vsyncadd [#allocation4], 4294967232 }
 0x1e7   :  { %947 = vsyncpa [#allocation3], 1 }
 0x1e8   :  { %948 = vsyncpa [#allocation6], 1 }
 0x1e9   :  { %949 = vsyncpa [#allocation9], 1 }
 0x1ea   :  { %950 = vsyncpa [#allocation4], 1 }

</bundles_post_ra>
